<compile_context>
chip_gen: v6e
topology: v6e:2x2x1
jax: 0.10.0
libtpu: 0.0.40
codegen_flags: <defaults>
</compile_context>

<pallas_src>
import functools

import numpy as np
import jax
import jax.numpy as jnp
from jax.experimental import pallas as pl
from jax.experimental.pallas import tpu as pltpu

RADIUS = 3                   # scipy gaussian_filter(..., radius=3) -> 7 taps
NTAPS = 2 * RADIUS + 1


def _gaussian_taps(sigma, radius=RADIUS):
    """Exactly scipy.ndimage._gaussian_kernel1d(sigma, order=0, radius)."""
    x = np.arange(-radius, radius + 1, dtype=np.float64)
    phi = np.exp(-0.5 * (x / float(sigma)) ** 2)
    phi /= phi.sum()
    return tuple(float(v) for v in phi)


def _round_up(v, m):
    return (v + m - 1) // m * m


def _choose_strip(H, W_pad):
    """Strip height for the H-tiled grid.

    Multiple of 8 that divides H, capped so the padded strip plane
    ((SH+6) x W_pad f32) stays <= ~96 KiB (a couple dozen vregs live at a
    time, no spills), with >= 2 strips so the "parallel" grid axis can be
    split across v7x's two TensorCores.  Falls back to a single strip.
    """
    if H % 8 == 0 and H >= 16:
        cap = (98304 // (4 * W_pad)) - 2 * RADIUS     # ~96 KiB plane budget
        sh = min(H // 2, max(8, cap))
        sh = (sh // 8) * 8
        while sh >= 8:
            if H % sh == 0:
                return sh, H // sh
            sh -= 8
    return H, 1


def _dog_kernel(img_ref, on_ref, xpad_ref, hb1_ref, hb2_ref, *,
                taps1, taps2, H, W, SH, W_pad, n_strips):
    """One H-strip of the fused DoG: pad -> horizontal blur(x2) -> vertical+diff.

    img_ref : (H, W)                full image, resident in VMEM (const block).
    on_ref  : (SH, W_pad)           lane-dense DoG 'on' strip (blur1 - blur2).
    xpad_ref: (SH+6, W_pad+6)       symmetric-padded strip scratch.
    hb?_ref : (SH+6, W_pad)         horizontal-pass scratch per sigma.
    """
    R = RADIUS
    rows = SH + 2 * R
    i = pl.program_id(0)

    # ---- Stage 1: build the symmetric ('reflect') padded strip in VMEM ----
    if n_strips == 1:
        xpad_ref[R:R + H, R:R + W] = img_ref[0:H, :]
        for r in range(R):                                   # vertical halo
            xpad_ref[R - 1 - r:R - r, R:R + W] = img_ref[r:r + 1, :]
            xpad_ref[R + H + r:R + H + r + 1, R:R + W] = img_ref[H - 1 - r:H - r, :]
    else:
        @pl.when(i == 0)
        def _first():
            xpad_ref[R:rows, R:R + W] = img_ref[0:SH + R, :]
            for r in range(R):                               # reflect top rows
                xpad_ref[R - 1 - r:R - r, R:R + W] = img_ref[r:r + 1, :]

        @pl.when(i == n_strips - 1)
        def _last():
            xpad_ref[0:SH + R, R:R + W] = img_ref[H - SH - R:H, :]
            for r in range(R):                               # reflect bottom rows
                xpad_ref[SH + R + r:SH + R + r + 1, R:R + W] = \
                    img_ref[H - 1 - r:H - r, :]

        if n_strips > 2:
            @pl.when(jnp.logical_and(i != 0, i != n_strips - 1))
            def _interior():
                row0 = i * SH
                xpad_ref[0:rows, R:R + W] = img_ref[pl.ds(row0 - R, rows), :]

    # horizontal halo columns: reflect about the true image edge (col 0 / W-1)
    for c in range(R):
        xpad_ref[:, R - 1 - c:R - c] = xpad_ref[:, R + c:R + c + 1]
        xpad_ref[:, R + W + c:R + W + c + 1] = xpad_ref[:, R + W - 1 - c:R + W - c]

    # zero the lane-padding tail so cropped-away columns stay finite
    if W_pad > W:
        xpad_ref[:, W + 2 * R:] = jnp.zeros((rows, W_pad - W), jnp.float32)

    # ---- Stage 2: horizontal 7-tap pass, fused over both sigmas -------------
    # Gaussian taps are symmetric (taps[k] == taps[2R-k]): each shifted slice
    # is loaded once, mirrored slices are pre-added once and shared between
    # the sigma1 / sigma2 accumulators (which live in VMEM scratch, not vregs).
    c0 = xpad_ref[:, R:R + W_pad]
    hb1_ref[...] = taps1[R] * c0
    hb2_ref[...] = taps2[R] * c0
    for k in range(R):
        sk = xpad_ref[:, k:k + W_pad] + xpad_ref[:, 2 * R - k:2 * R - k + W_pad]
        hb1_ref[...] += taps1[k] * sk
        hb2_ref[...] += taps2[k] * sk

    # ---- Stage 3: vertical 7-tap pass + DoG difference, single lane-dense store
    acc = taps1[R] * hb1_ref[R:R + SH, :] - taps2[R] * hb2_ref[R:R + SH, :]
    for k in range(R):
        acc = acc + taps1[k] * (hb1_ref[k:k + SH, :] +
                                hb1_ref[2 * R - k:2 * R - k + SH, :])
        acc = acc - taps2[k] * (hb2_ref[k:k + SH, :] +
                                hb2_ref[2 * R - k:2 * R - k + SH, :])
    on_ref[...] = acc


def dog_on_response(x, sigma1, sigma2):
    """x: (1, 1, H, W) NCHW.  Returns x_on = G(sigma1)*x - G(sigma2)*x, (1,1,H,W)."""
    N, C, H, W = x.shape
    assert N == 1 and C == 1, "DoG_encoder semantics require a single (H, W) plane"
    img = x.reshape(H, W).astype(jnp.float32)

    W_pad = _round_up(W, 128)               # lane-dense compute / store width
    SH, n_strips = _choose_strip(H, W_pad)

    kernel = functools.partial(
        _dog_kernel,
        taps1=_gaussian_taps(sigma1), taps2=_gaussian_taps(sigma2),
        H=H, W=W, SH=SH, W_pad=W_pad, n_strips=n_strips)

    flops = 40 * n_strips * SH * W_pad                       # ~2 blurs x 2 passes
    bytes_accessed = 4 * (H * W + n_strips * SH * W_pad)

    on = pl.pallas_call(
        kernel,
        out_shape=jax.ShapeDtypeStruct((n_strips * SH, W_pad), jnp.float32),
        grid=(n_strips,),
        in_specs=[pl.BlockSpec((H, W), lambda i: (0, 0))],   # resident, DMA'd once
        out_specs=pl.BlockSpec((SH, W_pad), lambda i: (i, 0)),
        scratch_shapes=[
            pltpu.VMEM((SH + 2 * RADIUS, W_pad + 2 * RADIUS), jnp.float32),
            pltpu.VMEM((SH + 2 * RADIUS, W_pad), jnp.float32),
            pltpu.VMEM((SH + 2 * RADIUS, W_pad), jnp.float32),
        ],
        compiler_params=pltpu.CompilerParams(
            dimension_semantics=("parallel",),
            vmem_limit_bytes=32 * 1024 * 1024),
        cost_estimate=pl.CostEstimate(
            flops=flops, transcendentals=0, bytes_accessed=bytes_accessed),
    )(img)

    on = on[:H, :W]                                          # crop lane padding
    return on.reshape(N, C, H, W)


def dog_encoder(x_on, num_layers=6, total_time=15):
    """Rank-order temporal coding (plain JAX; data-dependent argsort).

    Reproduces DoG_encoder: sort pixels by ascending 1/x (== descending x; the
    reference does NOT clamp negative DoG values, so negative responses
    legitimately spike first), drop pixels whose reciprocal is +inf, bin ranks
    into (total_time - num_layers) steps, emit one spike per kept pixel.
    Returns (1, 1, H, W, total_time).
    """
    # TODO(synk): np.delete with a data-dependent count has no static-shape
    # equivalent; implemented via masking (identical result) instead.
    H, W = x_on.shape[-2], x_on.shape[-1]
    flat = x_on.reshape(H * W)
    inv = 1.0 / flat
    order = jnp.argsort(inv)              # ascending 1/x == descending x
    lat = inv[order]
    valid = lat != jnp.inf                # entries np.delete would remove
    n_valid = jnp.sum(valid).astype(jnp.float32)
    n_valid = jnp.maximum(n_valid, 1.0)   # guard all-zero image (ref emits no spikes)

    n_bins = float(total_time - num_layers)                  # 15 - 6 = 9
    ranks = jnp.arange(H * W, dtype=jnp.float32)
    t_step = jnp.ceil(ranks / (n_valid / n_bins)).astype(jnp.int32)

    spikes_sorted = jax.nn.one_hot(t_step, total_time, dtype=jnp.float32)
    spikes_sorted = spikes_sorted * valid[:, None].astype(jnp.float32)

    spikes = jnp.zeros((H * W, total_time), jnp.float32).at[order].set(spikes_sorted)
    return spikes.reshape(1, 1, H, W, total_time)


def dog_filter_forward(x, sigma1, sigma2):
    """Forward pass of DoGFilter: returns the spike-encoded x_on (1,1,H,W,15)."""
    x_on = dog_on_response(x, sigma1, sigma2)
    # x_off = -x_on and torch.cat((x_on, x_off), dim=1) are dead code in the
    # reference forward (result unused); omitted.
    return dog_encoder(x_on, num_layers=6, total_time=15)


def _dog_reference(img, sigma1, sigma2):
    """Pure-JAX separable reference (scipy 'reflect' == numpy 'symmetric')."""
    def blur(img, taps):
        t = jnp.asarray(taps, jnp.float32)
        p = jnp.pad(img, RADIUS, mode="symmetric")
        h = sum(t[k] * p[:, k:k + img.shape[1]] for k in range(NTAPS))
        return sum(t[k] * h[k:k + img.shape[0], :] for k in range(NTAPS))
    return blur(img, _gaussian_taps(sigma1)) - blur(img, _gaussian_taps(sigma2))


if __name__ == "__main__":
    key = jax.random.PRNGKey(0)
    N, C, H, W = 1, 1, 16, 16
    sigma1, sigma2 = 1.0, 2.0
    # positive "luminance" image, like the original 240x160 grayscale input
    x = jax.random.uniform(key, (N, C, H, W), dtype=jnp.float32,
                           minval=0.05, maxval=1.0)

    # Pallas DoG vs pure-JAX reference
    x_on = jax.block_until_ready(dog_on_response(x, sigma1, sigma2))
    ref = _dog_reference(x.reshape(H, W), sigma1, sigma2)
    assert jnp.allclose(x_on.reshape(H, W), ref, atol=1e-5, rtol=1e-5)

    # full forward (DoG + spike encoder)
    spikes = jax.block_until_ready(dog_filter_forward(x, sigma1, sigma2))

    assert spikes.shape == (1, 1, H, W, 15)
    assert spikes.dtype == jnp.float32
    # every pixel with finite reciprocal DoG response fires at most once
    assert float(jnp.max(jnp.sum(spikes, axis=-1))) <= 1.0
    print("KERNEL_OK")
</pallas_src>

<mosaic_0001>
module attributes {stable_mosaic.version = 11 : i64} {
  func.func @_dog_kernel(%arg0: i32, %arg1: memref<16x16xf32, #tpu.memory_space<vmem>>, %arg2: memref<8x128xf32, #tpu.memory_space<vmem>>, %arg3: memref<14x134xf32, #tpu.memory_space<vmem>>, %arg4: memref<14x128xf32, #tpu.memory_space<vmem>>, %arg5: memref<14x128xf32, #tpu.memory_space<vmem>>) attributes {dimension_semantics = [#tpu.dimension_semantics<parallel>], iteration_bounds = array<i64: 2>, scalar_prefetch = 0 : i64, scratch_operands = 3 : i64, tpu.core_type = #tpu.core_type<tc>, window_params = [{pipeline_mode = #tpu.pipeline_mode<synchronous>, transform_indices = @transform_0, window_bounds = array<i64: 16, 16>}, {transform_indices = @transform_1, window_bounds = array<i64: 8, 128>}]} {
    %c0_i32 = arith.constant 0 : i32
    %0 = arith.cmpi eq, %arg0, %c0_i32 : i32
    %1 = arith.extui %0 : i1 to i32
    %c0_i32_0 = arith.constant 0 : i32
    %2 = arith.cmpi ne, %1, %c0_i32_0 : i32
    scf.if %2 {
      %c0_102 = arith.constant 0 : index
      %c0_103 = arith.constant 0 : index
      %110 = vector.load %arg1[%c0_102, %c0_103] : memref<16x16xf32, #tpu.memory_space<vmem>>, vector<11x16xf32>
      %c3_104 = arith.constant 3 : index
      %c3_105 = arith.constant 3 : index
      %111 = vector.load %arg3[%c3_104, %c3_105] : memref<14x134xf32, #tpu.memory_space<vmem>>, vector<11x16xf32>
      tpu.vector_store %arg3[%c3_104, %c3_105], %110 {strides = array<i32>} : memref<14x134xf32, #tpu.memory_space<vmem>>, vector<11x16xf32>,
      %c0_106 = arith.constant 0 : index
      %c0_107 = arith.constant 0 : index
      %112 = vector.load %arg1[%c0_106, %c0_107] : memref<16x16xf32, #tpu.memory_space<vmem>>, vector<1x16xf32>
      %c2_108 = arith.constant 2 : index
      %c3_109 = arith.constant 3 : index
      %113 = vector.load %arg3[%c2_108, %c3_109] : memref<14x134xf32, #tpu.memory_space<vmem>>, vector<1x16xf32>
      tpu.vector_store %arg3[%c2_108, %c3_109], %112 {strides = array<i32>} : memref<14x134xf32, #tpu.memory_space<vmem>>, vector<1x16xf32>,
      %c1_110 = arith.constant 1 : index
      %c0_111 = arith.constant 0 : index
      %114 = vector.load %arg1[%c1_110, %c0_111] : memref<16x16xf32, #tpu.memory_space<vmem>>, vector<1x16xf32>
      %c1_112 = arith.constant 1 : index
      %c3_113 = arith.constant 3 : index
      %115 = vector.load %arg3[%c1_112, %c3_113] : memref<14x134xf32, #tpu.memory_space<vmem>>, vector<1x16xf32>
      tpu.vector_store %arg3[%c1_112, %c3_113], %114 {strides = array<i32>} : memref<14x134xf32, #tpu.memory_space<vmem>>, vector<1x16xf32>,
      %c2_114 = arith.constant 2 : index
      %c0_115 = arith.constant 0 : index
      %116 = vector.load %arg1[%c2_114, %c0_115] : memref<16x16xf32, #tpu.memory_space<vmem>>, vector<1x16xf32>
      %c0_116 = arith.constant 0 : index
      %c3_117 = arith.constant 3 : index
      %117 = vector.load %arg3[%c0_116, %c3_117] : memref<14x134xf32, #tpu.memory_space<vmem>>, vector<1x16xf32>
      tpu.vector_store %arg3[%c0_116, %c3_117], %116 {strides = array<i32>} : memref<14x134xf32, #tpu.memory_space<vmem>>, vector<1x16xf32>,
    } else {
    }
    %c1_i32 = arith.constant 1 : i32
    %3 = arith.cmpi eq, %arg0, %c1_i32 : i32
    %4 = arith.extui %3 : i1 to i32
    %c0_i32_1 = arith.constant 0 : i32
    %5 = arith.cmpi ne, %4, %c0_i32_1 : i32
    scf.if %5 {
      %c5_102 = arith.constant 5 : index
      %c0_103 = arith.constant 0 : index
      %110 = vector.load %arg1[%c5_102, %c0_103] : memref<16x16xf32, #tpu.memory_space<vmem>>, vector<11x16xf32>
      %c0_104 = arith.constant 0 : index
      %c3_105 = arith.constant 3 : index
      %111 = vector.load %arg3[%c0_104, %c3_105] : memref<14x134xf32, #tpu.memory_space<vmem>>, vector<11x16xf32>
      tpu.vector_store %arg3[%c0_104, %c3_105], %110 {strides = array<i32>} : memref<14x134xf32, #tpu.memory_space<vmem>>, vector<11x16xf32>,
      %c15 = arith.constant 15 : index
      %c0_106 = arith.constant 0 : index
      %112 = vector.load %arg1[%c15, %c0_106] : memref<16x16xf32, #tpu.memory_space<vmem>>, vector<1x16xf32>
      %c11 = arith.constant 11 : index
      %c3_107 = arith.constant 3 : index
      %113 = vector.load %arg3[%c11, %c3_107] : memref<14x134xf32, #tpu.memory_space<vmem>>, vector<1x16xf32>
      tpu.vector_store %arg3[%c11, %c3_107], %112 {strides = array<i32>} : memref<14x134xf32, #tpu.memory_space<vmem>>, vector<1x16xf32>,
      %c14 = arith.constant 14 : index
      %c0_108 = arith.constant 0 : index
      %114 = vector.load %arg1[%c14, %c0_108] : memref<16x16xf32, #tpu.memory_space<vmem>>, vector<1x16xf32>
      %c12 = arith.constant 12 : index
      %c3_109 = arith.constant 3 : index
      %115 = vector.load %arg3[%c12, %c3_109] : memref<14x134xf32, #tpu.memory_space<vmem>>, vector<1x16xf32>
      tpu.vector_store %arg3[%c12, %c3_109], %114 {strides = array<i32>} : memref<14x134xf32, #tpu.memory_space<vmem>>, vector<1x16xf32>,
      %c13 = arith.constant 13 : index
      %c0_110 = arith.constant 0 : index
      %116 = vector.load %arg1[%c13, %c0_110] : memref<16x16xf32, #tpu.memory_space<vmem>>, vector<1x16xf32>
      %c13_111 = arith.constant 13 : index
      %c3_112 = arith.constant 3 : index
      %117 = vector.load %arg3[%c13_111, %c3_112] : memref<14x134xf32, #tpu.memory_space<vmem>>, vector<1x16xf32>
      tpu.vector_store %arg3[%c13_111, %c3_112], %116 {strides = array<i32>} : memref<14x134xf32, #tpu.memory_space<vmem>>, vector<1x16xf32>,
    } else {
    }
    %c0 = arith.constant 0 : index
    %c3 = arith.constant 3 : index
    %6 = vector.load %arg3[%c0, %c3] : memref<14x134xf32, #tpu.memory_space<vmem>>, vector<14x1xf32>
    %c0_2 = arith.constant 0 : index
    %c2 = arith.constant 2 : index
    %7 = vector.load %arg3[%c0_2, %c2] : memref<14x134xf32, #tpu.memory_space<vmem>>, vector<14x1xf32>
    tpu.vector_store %arg3[%c0_2, %c2], %6 {strides = array<i32>} : memref<14x134xf32, #tpu.memory_space<vmem>>, vector<14x1xf32>,
    %c0_3 = arith.constant 0 : index
    %c18 = arith.constant 18 : index
    %8 = vector.load %arg3[%c0_3, %c18] : memref<14x134xf32, #tpu.memory_space<vmem>>, vector<14x1xf32>
    %c0_4 = arith.constant 0 : index
    %c19 = arith.constant 19 : index
    %9 = vector.load %arg3[%c0_4, %c19] : memref<14x134xf32, #tpu.memory_space<vmem>>, vector<14x1xf32>
    tpu.vector_store %arg3[%c0_4, %c19], %8 {strides = array<i32>} : memref<14x134xf32, #tpu.memory_space<vmem>>, vector<14x1xf32>,
    %c0_5 = arith.constant 0 : index
    %c4 = arith.constant 4 : index
    %10 = vector.load %arg3[%c0_5, %c4] : memref<14x134xf32, #tpu.memory_space<vmem>>, vector<14x1xf32>
    %c0_6 = arith.constant 0 : index
    %c1 = arith.constant 1 : index
    %11 = vector.load %arg3[%c0_6, %c1] : memref<14x134xf32, #tpu.memory_space<vmem>>, vector<14x1xf32>
    tpu.vector_store %arg3[%c0_6, %c1], %10 {strides = array<i32>} : memref<14x134xf32, #tpu.memory_space<vmem>>, vector<14x1xf32>,
    %c0_7 = arith.constant 0 : index
    %c17 = arith.constant 17 : index
    %12 = vector.load %arg3[%c0_7, %c17] : memref<14x134xf32, #tpu.memory_space<vmem>>, vector<14x1xf32>
    %c0_8 = arith.constant 0 : index
    %c20 = arith.constant 20 : index
    %13 = vector.load %arg3[%c0_8, %c20] : memref<14x134xf32, #tpu.memory_space<vmem>>, vector<14x1xf32>
    tpu.vector_store %arg3[%c0_8, %c20], %12 {strides = array<i32>} : memref<14x134xf32, #tpu.memory_space<vmem>>, vector<14x1xf32>,
    %c0_9 = arith.constant 0 : index
    %c5 = arith.constant 5 : index
    %14 = vector.load %arg3[%c0_9, %c5] : memref<14x134xf32, #tpu.memory_space<vmem>>, vector<14x1xf32>
    %c0_10 = arith.constant 0 : index
    %c0_11 = arith.constant 0 : index
    %15 = vector.load %arg3[%c0_10, %c0_11] : memref<14x134xf32, #tpu.memory_space<vmem>>, vector<14x1xf32>
    tpu.vector_store %arg3[%c0_10, %c0_11], %14 {strides = array<i32>} : memref<14x134xf32, #tpu.memory_space<vmem>>, vector<14x1xf32>,
    %c0_12 = arith.constant 0 : index
    %c16 = arith.constant 16 : index
    %16 = vector.load %arg3[%c0_12, %c16] : memref<14x134xf32, #tpu.memory_space<vmem>>, vector<14x1xf32>
    %c0_13 = arith.constant 0 : index
    %c21 = arith.constant 21 : index
    %17 = vector.load %arg3[%c0_13, %c21] : memref<14x134xf32, #tpu.memory_space<vmem>>, vector<14x1xf32>
    tpu.vector_store %arg3[%c0_13, %c21], %16 {strides = array<i32>} : memref<14x134xf32, #tpu.memory_space<vmem>>, vector<14x1xf32>,
    %cst = arith.constant 0.000000e+00 : f32
    %18 = vector.broadcast %cst : f32 to vector<14x112xf32>
    %c0_14 = arith.constant 0 : index
    %c22 = arith.constant 22 : index
    %19 = vector.load %arg3[%c0_14, %c22] : memref<14x134xf32, #tpu.memory_space<vmem>>, vector<14x112xf32>
    tpu.vector_store %arg3[%c0_14, %c22], %18 {strides = array<i32>} : memref<14x134xf32, #tpu.memory_space<vmem>>, vector<14x112xf32>,
    %c0_15 = arith.constant 0 : index
    %c3_16 = arith.constant 3 : index
    %20 = vector.load %arg3[%c0_15, %c3_16] : memref<14x134xf32, #tpu.memory_space<vmem>>, vector<14x128xf32>
    %cst_17 = arith.constant 0.399050266 : f32
    %21 = vector.broadcast %cst_17 : f32 to vector<14x128xf32>
    %22 = arith.mulf %21, %20 : vector<14x128xf32>
    %c0_18 = arith.constant 0 : index
    %c0_19 = arith.constant 0 : index
    %23 = vector.load %arg4[%c0_18, %c0_19] : memref<14x128xf32, #tpu.memory_space<vmem>>, vector<14x128xf32>
    tpu.vector_store %arg4[%c0_18, %c0_19], %22 {strides = array<i32>} : memref<14x128xf32, #tpu.memory_space<vmem>>, vector<14x128xf32>,
    %cst_20 = arith.constant 0.216105938 : f32
    %24 = vector.broadcast %cst_20 : f32 to vector<14x128xf32>
    %25 = arith.mulf %24, %20 : vector<14x128xf32>
    %c0_21 = arith.constant 0 : index
    %c0_22 = arith.constant 0 : index
    %26 = vector.load %arg5[%c0_21, %c0_22] : memref<14x128xf32, #tpu.memory_space<vmem>>, vector<14x128xf32>
    tpu.vector_store %arg5[%c0_21, %c0_22], %25 {strides = array<i32>} : memref<14x128xf32, #tpu.memory_space<vmem>>, vector<14x128xf32>,
    %c0_23 = arith.constant 0 : index
    %c0_24 = arith.constant 0 : index
    %27 = vector.load %arg3[%c0_23, %c0_24] : memref<14x134xf32, #tpu.memory_space<vmem>>, vector<14x128xf32>
    %c0_25 = arith.constant 0 : index
    %c6 = arith.constant 6 : index
    %28 = vector.load %arg3[%c0_25, %c6] : memref<14x134xf32, #tpu.memory_space<vmem>>, vector<14x128xf32>
    %29 = arith.addf %27, %28 : vector<14x128xf32>
    %c0_26 = arith.constant 0 : index
    %c0_27 = arith.constant 0 : index
    %30 = vector.load %arg4[%c0_26, %c0_27] : memref<14x128xf32, #tpu.memory_space<vmem>>, vector<14x128xf32>
    %cst_28 = arith.constant 0.00443304796 : f32
    %31 = vector.broadcast %cst_28 : f32 to vector<14x128xf32>
    %32 = arith.mulf %31, %29 : vector<14x128xf32>
    %33 = arith.addf %30, %32 : vector<14x128xf32>
    %c0_29 = arith.constant 0 : index
    %c0_30 = arith.constant 0 : index
    %34 = vector.load %arg4[%c0_29, %c0_30] : memref<14x128xf32, #tpu.memory_space<vmem>>, vector<14x128xf32>
    tpu.vector_store %arg4[%c0_29, %c0_30], %33 {strides = array<i32>} : memref<14x128xf32, #tpu.memory_space<vmem>>, vector<14x128xf32>,
    %c0_31 = arith.constant 0 : index
    %c0_32 = arith.constant 0 : index
    %35 = vector.load %arg5[%c0_31, %c0_32] : memref<14x128xf32, #tpu.memory_space<vmem>>, vector<14x128xf32>
    %cst_33 = arith.constant 0.0701593235 : f32
    %36 = vector.broadcast %cst_33 : f32 to vector<14x128xf32>
    %37 = arith.mulf %36, %29 : vector<14x128xf32>
    %38 = arith.addf %35, %37 : vector<14x128xf32>
    %c0_34 = arith.constant 0 : index
    %c0_35 = arith.constant 0 : index
    %39 = vector.load %arg5[%c0_34, %c0_35] : memref<14x128xf32, #tpu.memory_space<vmem>>, vector<14x128xf32>
    tpu.vector_store %arg5[%c0_34, %c0_35], %38 {strides = array<i32>} : memref<14x128xf32, #tpu.memory_space<vmem>>, vector<14x128xf32>,
    %c0_36 = arith.constant 0 : index
    %c1_37 = arith.constant 1 : index
    %40 = vector.load %arg3[%c0_36, %c1_37] : memref<14x134xf32, #tpu.memory_space<vmem>>, vector<14x128xf32>
    %c0_38 = arith.constant 0 : index
    %c5_39 = arith.constant 5 : index
    %41 = vector.load %arg3[%c0_38, %c5_39] : memref<14x134xf32, #tpu.memory_space<vmem>>, vector<14x128xf32>
    %42 = arith.addf %40, %41 : vector<14x128xf32>
    %c0_40 = arith.constant 0 : index
    %c0_41 = arith.constant 0 : index
    %43 = vector.load %arg4[%c0_40, %c0_41] : memref<14x128xf32, #tpu.memory_space<vmem>>, vector<14x128xf32>
    %cst_42 = arith.constant 0.0540055819 : f32
    %44 = vector.broadcast %cst_42 : f32 to vector<14x128xf32>
    %45 = arith.mulf %44, %42 : vector<14x128xf32>
    %46 = arith.addf %43, %45 : vector<14x128xf32>
    %c0_43 = arith.constant 0 : index
    %c0_44 = arith.constant 0 : index
    %47 = vector.load %arg4[%c0_43, %c0_44] : memref<14x128xf32, #tpu.memory_space<vmem>>, vector<14x128xf32>
    tpu.vector_store %arg4[%c0_43, %c0_44], %46 {strides = array<i32>} : memref<14x128xf32, #tpu.memory_space<vmem>>, vector<14x128xf32>,
    %c0_45 = arith.constant 0 : index
    %c0_46 = arith.constant 0 : index
    %48 = vector.load %arg5[%c0_45, %c0_46] : memref<14x128xf32, #tpu.memory_space<vmem>>, vector<14x128xf32>
    %cst_47 = arith.constant 0.131074876 : f32
    %49 = vector.broadcast %cst_47 : f32 to vector<14x128xf32>
    %50 = arith.mulf %49, %42 : vector<14x128xf32>
    %51 = arith.addf %48, %50 : vector<14x128xf32>
    %c0_48 = arith.constant 0 : index
    %c0_49 = arith.constant 0 : index
    %52 = vector.load %arg5[%c0_48, %c0_49] : memref<14x128xf32, #tpu.memory_space<vmem>>, vector<14x128xf32>
    tpu.vector_store %arg5[%c0_48, %c0_49], %51 {strides = array<i32>} : memref<14x128xf32, #tpu.memory_space<vmem>>, vector<14x128xf32>,
    %c0_50 = arith.constant 0 : index
    %c2_51 = arith.constant 2 : index
    %53 = vector.load %arg3[%c0_50, %c2_51] : memref<14x134xf32, #tpu.memory_space<vmem>>, vector<14x128xf32>
    %c0_52 = arith.constant 0 : index
    %c4_53 = arith.constant 4 : index
    %54 = vector.load %arg3[%c0_52, %c4_53] : memref<14x134xf32, #tpu.memory_space<vmem>>, vector<14x128xf32>
    %55 = arith.addf %53, %54 : vector<14x128xf32>
    %c0_54 = arith.constant 0 : index
    %c0_55 = arith.constant 0 : index
    %56 = vector.load %arg4[%c0_54, %c0_55] : memref<14x128xf32, #tpu.memory_space<vmem>>, vector<14x128xf32>
    %cst_56 = arith.constant 0.242036223 : f32
    %57 = vector.broadcast %cst_56 : f32 to vector<14x128xf32>
    %58 = arith.mulf %57, %55 : vector<14x128xf32>
    %59 = arith.addf %56, %58 : vector<14x128xf32>
    %c0_57 = arith.constant 0 : index
    %c0_58 = arith.constant 0 : index
    %60 = vector.load %arg4[%c0_57, %c0_58] : memref<14x128xf32, #tpu.memory_space<vmem>>, vector<14x128xf32>
    tpu.vector_store %arg4[%c0_57, %c0_58], %59 {strides = array<i32>} : memref<14x128xf32, #tpu.memory_space<vmem>>, vector<14x128xf32>,
    %c0_59 = arith.constant 0 : index
    %c0_60 = arith.constant 0 : index
    %61 = vector.load %arg5[%c0_59, %c0_60] : memref<14x128xf32, #tpu.memory_space<vmem>>, vector<14x128xf32>
    %cst_61 = arith.constant 0.190712824 : f32
    %62 = vector.broadcast %cst_61 : f32 to vector<14x128xf32>
    %63 = arith.mulf %62, %55 : vector<14x128xf32>
    %64 = arith.addf %61, %63 : vector<14x128xf32>
    %c0_62 = arith.constant 0 : index
    %c0_63 = arith.constant 0 : index
    %65 = vector.load %arg5[%c0_62, %c0_63] : memref<14x128xf32, #tpu.memory_space<vmem>>, vector<14x128xf32>
    tpu.vector_store %arg5[%c0_62, %c0_63], %64 {strides = array<i32>} : memref<14x128xf32, #tpu.memory_space<vmem>>, vector<14x128xf32>,
    %c3_64 = arith.constant 3 : index
    %c0_65 = arith.constant 0 : index
    %66 = vector.load %arg4[%c3_64, %c0_65] : memref<14x128xf32, #tpu.memory_space<vmem>>, vector<8x128xf32>
    %cst_66 = arith.constant 0.399050266 : f32
    %67 = vector.broadcast %cst_66 : f32 to vector<8x128xf32>
    %68 = arith.mulf %67, %66 : vector<8x128xf32>
    %c3_67 = arith.constant 3 : index
    %c0_68 = arith.constant 0 : index
    %69 = vector.load %arg5[%c3_67, %c0_68] : memref<14x128xf32, #tpu.memory_space<vmem>>, vector<8x128xf32>
    %cst_69 = arith.constant 0.216105938 : f32
    %70 = vector.broadcast %cst_69 : f32 to vector<8x128xf32>
    %71 = arith.mulf %70, %69 : vector<8x128xf32>
    %72 = arith.subf %68, %71 : vector<8x128xf32>
    %c0_70 = arith.constant 0 : index
    %c0_71 = arith.constant 0 : index
    %73 = vector.load %arg4[%c0_70, %c0_71] : memref<14x128xf32, #tpu.memory_space<vmem>>, vector<8x128xf32>
    %c6_72 = arith.constant 6 : index
    %c0_73 = arith.constant 0 : index
    %74 = vector.load %arg4[%c6_72, %c0_73] : memref<14x128xf32, #tpu.memory_space<vmem>>, vector<8x128xf32>
    %75 = arith.addf %73, %74 : vector<8x128xf32>
    %cst_74 = arith.constant 0.00443304796 : f32
    %76 = vector.broadcast %cst_74 : f32 to vector<8x128xf32>
    %77 = arith.mulf %76, %75 : vector<8x128xf32>
    %78 = arith.addf %72, %77 : vector<8x128xf32>
    %c0_75 = arith.constant 0 : index
    %c0_76 = arith.constant 0 : index
    %79 = vector.load %arg5[%c0_75, %c0_76] : memref<14x128xf32, #tpu.memory_space<vmem>>, vector<8x128xf32>
    %c6_77 = arith.constant 6 : index
    %c0_78 = arith.constant 0 : index
    %80 = vector.load %arg5[%c6_77, %c0_78] : memref<14x128xf32, #tpu.memory_space<vmem>>, vector<8x128xf32>
    %81 = arith.addf %79, %80 : vector<8x128xf32>
    %cst_79 = arith.constant 0.0701593235 : f32
    %82 = vector.broadcast %cst_79 : f32 to vector<8x128xf32>
    %83 = arith.mulf %82, %81 : vector<8x128xf32>
    %84 = arith.subf %78, %83 : vector<8x128xf32>
    %c1_80 = arith.constant 1 : index
    %c0_81 = arith.constant 0 : index
    %85 = vector.load %arg4[%c1_80, %c0_81] : memref<14x128xf32, #tpu.memory_space<vmem>>, vector<8x128xf32>
    %c5_82 = arith.constant 5 : index
    %c0_83 = arith.constant 0 : index
    %86 = vector.load %arg4[%c5_82, %c0_83] : memref<14x128xf32, #tpu.memory_space<vmem>>, vector<8x128xf32>
    %87 = arith.addf %85, %86 : vector<8x128xf32>
    %cst_84 = arith.constant 0.0540055819 : f32
    %88 = vector.broadcast %cst_84 : f32 to vector<8x128xf32>
    %89 = arith.mulf %88, %87 : vector<8x128xf32>
    %90 = arith.addf %84, %89 : vector<8x128xf32>
    %c1_85 = arith.constant 1 : index
    %c0_86 = arith.constant 0 : index
    %91 = vector.load %arg5[%c1_85, %c0_86] : memref<14x128xf32, #tpu.memory_space<vmem>>, vector<8x128xf32>
    %c5_87 = arith.constant 5 : index
    %c0_88 = arith.constant 0 : index
    %92 = vector.load %arg5[%c5_87, %c0_88] : memref<14x128xf32, #tpu.memory_space<vmem>>, vector<8x128xf32>
    %93 = arith.addf %91, %92 : vector<8x128xf32>
    %cst_89 = arith.constant 0.131074876 : f32
    %94 = vector.broadcast %cst_89 : f32 to vector<8x128xf32>
    %95 = arith.mulf %94, %93 : vector<8x128xf32>
    %96 = arith.subf %90, %95 : vector<8x128xf32>
    %c2_90 = arith.constant 2 : index
    %c0_91 = arith.constant 0 : index
    %97 = vector.load %arg4[%c2_90, %c0_91] : memref<14x128xf32, #tpu.memory_space<vmem>>, vector<8x128xf32>
    %c4_92 = arith.constant 4 : index
    %c0_93 = arith.constant 0 : index
    %98 = vector.load %arg4[%c4_92, %c0_93] : memref<14x128xf32, #tpu.memory_space<vmem>>, vector<8x128xf32>
    %99 = arith.addf %97, %98 : vector<8x128xf32>
    %cst_94 = arith.constant 0.242036223 : f32
    %100 = vector.broadcast %cst_94 : f32 to vector<8x128xf32>
    %101 = arith.mulf %100, %99 : vector<8x128xf32>
    %102 = arith.addf %96, %101 : vector<8x128xf32>
    %c2_95 = arith.constant 2 : index
    %c0_96 = arith.constant 0 : index
    %103 = vector.load %arg5[%c2_95, %c0_96] : memref<14x128xf32, #tpu.memory_space<vmem>>, vector<8x128xf32>
    %c4_97 = arith.constant 4 : index
    %c0_98 = arith.constant 0 : index
    %104 = vector.load %arg5[%c4_97, %c0_98] : memref<14x128xf32, #tpu.memory_space<vmem>>, vector<8x128xf32>
    %105 = arith.addf %103, %104 : vector<8x128xf32>
    %cst_99 = arith.constant 0.190712824 : f32
    %106 = vector.broadcast %cst_99 : f32 to vector<8x128xf32>
    %107 = arith.mulf %106, %105 : vector<8x128xf32>
    %108 = arith.subf %102, %107 : vector<8x128xf32>
    %c0_100 = arith.constant 0 : index
    %c0_101 = arith.constant 0 : index
    %109 = vector.load %arg2[%c0_100, %c0_101] : memref<8x128xf32, #tpu.memory_space<vmem>>, vector<8x128xf32>
    tpu.vector_store %arg2[%c0_100, %c0_101], %108 {strides = array<i32>} : memref<8x128xf32, #tpu.memory_space<vmem>>, vector<8x128xf32>,
    return
  }
  func.func @transform_0(%arg0: i32) -> (i32, i32) {
    %c0_i32 = arith.constant 0 : i32
    %c0_i32_0 = arith.constant 0 : i32
    %c0_i32_1 = arith.constant 0 : i32
    return %c0_i32, %c0_i32_0 : i32, i32
  }
  func.func @transform_1(%arg0: i32) -> (i32, i32) {
    %c0_i32 = arith.constant 0 : i32
    %c0_i32_0 = arith.constant 0 : i32
    return %arg0, %c0_i32 : i32, i32
  }
}

</mosaic_0001>

<bundles_post_ra>
// kernel: tpu_custom_call.1
= control target key start
LH: loop header
LB: loop body
LE: loop exit
PB: predicated region body
PF: predicated region fallthrough
CT: control target
= control target key end

     0   :  { %6 = vsyncpa [#allocation6], 0  ;;  %s1015_s0 = inlined_call_operand.hbm [shape: f32[16,16], index: 0, kind: input, shape index: {}]   ;;  %s1016_s1 = inlined_call_operand.hbm [shape: f32[16,128], index: 1, kind: output, shape index: {}]  }
   0x1   :  { %7 = vsyncpa [#allocation7], 0 }
   0x2   :  { %9 = vsyncpa [#allocation7 + $0x1], 0  ;;  %s830_s6 = smov 0   ;;  %s832_s7 = smov 0  }
   0x3   :  { %s834_s8 = smov 0   ;;  %s836_s9 = smov 0  }
   0x4 LB: > { %s851_s10 = sadd.s32 4294967295, %s802_s9   ;;  %s636_s11 = sadd.s32 4294967294, %s802_s9   ;;  %s802_s9 = sphi %s836_s9, %s1025_s9   ;;  %s798_s8 = sphi %s834_s8, %s1024_s8   ;;  %s794_s7 = sphi %s832_s7, %s1023_s7   ;;  %s790_s6 = sphi %s830_s6, %s1022_s6  }
   0x5   : > { %s855_s12 = sadd.s32 1, %s802_s9   ;;  %s43_s13 = sadd.s32 1, %s798_s8 }
   0x6   : > { %s40_s14 = ssub.s32 %s802_s9, %s855_s12  ;;  %p53_p0 = scmp.ne.s32.totalorder %s798_s8, %s794_s7 }
   0x7   : > { %p41_p1 = scmp.eq.s32.totalorder %s40_s14, 0  ;;  %p54_p2 = scmp.eq.s32.totalorder %s851_s10, 1 }
   0x8   : > { %p59_p3 = scmp.ne.s32.totalorder %s794_s7, %s790_s6  ;;  %p60_p4 = scmp.eq.s32.totalorder %s636_s11, 1 }
   0x9   : > { %s866_s15 = scalar_select %p41_p1, %s798_s8, %s43_s13  }
   0xa   : > { %p868_p5 = por %p54_p2, %p53_p0  ;;  %p872_p6 = por %p60_p4, %p59_p3 }
   0xb   : > { %p637_p7 = scmp.ge.s32.totalorder %s802_s9, 1  ;;  %p67_p8 = scmp.lt.s32.totalorder %s802_s9, 3 }
   0xc   : > { %s1018_s17 = scalar_select %p872_p6, 1, 0 }
   0xd   : > { %p662_p10 = scmp.eq.s32.totalorder %s851_s10, 0  ;;  %p880_p11 = pnand %p637_p7, %p67_p8 }
   0xe   : > { %s804_s19 = smov [#allocation5]  }
   0xf   : > { %s79_s20 = sshll.u32 %s804_s19, 4  ;;  %p654_p12 = pneg %p880_p11  ;;  %s80_s20 = int_to_ptr.vmem [resolvable:$true] %s79_s20 }
  0x10   : > { %s723_s21 = scalar_lea.vmem %s80_s20, 256  ;;  %p731_p4 = scmp.lt.s32.totalorder %s80_s20, %s80_s20 }
  0x11   : > { %p655_p13 = pnand %p662_p10, %p654_p12  ;;  %p724_p1 = scmp.ne.s32.totalorder %s80_s20, %s723_s21 }
  0x12   : > { %p732_p9 = scmp.lt.s32.totalorder %s723_s21, %s723_s21 }
  0x13   : > { %p714_p0 = pneg %p655_p13 }
  0x14   : > { %p733_p6 = por %p732_p9, %p731_p4 }
  0x15   : > { %p726_p2 = pnand %p724_p1, %p714_p0 }
  0x17   : > { %p727_p3 = pneg %p726_p2 }
  0x19   : > { %p734_p7 = pnand %p733_p6, %p727_p3 }
  0x1b   : > { %737 = shalt.err (!%p734_p7)
}
  0x1c   : > { %s805_s22 = smov 128   ;;  %s806_s23 = smov 8  }
  0x1d   : > { %657 = dma.hbm_to_vmem [thread:$0]  (!%p655_p13), %s1015_s0, 256, %s80_s20, [#allocation6], %s805_s22, %s805_s22, %s806_s23  }
  0x1e   : > { %95 = sbr.rel (%p880_p11) target bundleno = 1347 (0x543), region = 24 }
  0x23   : > { %781 = dma.done.wait (%p662_p10), [#allocation6], 256  }
  0x24   : > { %783 = vsyncadd (%p662_p10), [#allocation6], 4294967040  ;;  %s107_s26 = sand.u32 1, %s794_s7   ;;  %p1020_p6 = scmp.ne.s32.totalorder %s851_s10, 0 }
  0x25   : > { %s900_s27 = sshll.u32 %s107_s26, 3  ;;  %s807_s29 = smov (!%p1020_p6), 3  }
  0x26   : > { %s109_s28 = scalar_lea.vmem [#allocation8], %s900_s27  ;;  %113 = sbr.rel (%p1020_p6) target bundleno = 170 (0xaa), region = 32 }
  0x2b   : > { %v114_v0 = vld [vmem:[#allocation5] sm:$0xff]  ;;  %v115_v2 = vld [vmem:[#allocation5 + $0x8] sm:$0x7]  ;;  %vm118_vm0 = vcmask 1042432   ;;  %vm137_vm1 = vcmask 147480   ;;  %vm128_vm2 = vcmask 154651  }
  0x2c   : > { %v132_v1 = vld [vmem:[#allocation5] sm:$0x1]  ;;  %v119_v3 = vrot.slane %v114_v0, 5  ;;  %v120_v4 = vrot.slane %v115_v2, 5  ;;  %v139_v5 = vld [vmem:[#allocation5 + $0x1] sm:$0x1] }
  0x2d   : > { %134 = vrot.lane.b32.xlu1 %v132_v1, %s807_s29  ;;  %v145_v7 = vld [vmem:[#allocation5 + $0x2] sm:$0x1]  ;;  %vm130_vm3 = vcmask 152600  }
  0x2e   : > { %122 = vrot.lane.b32.xlu0 %v119_v3, %s807_s29  ;;  %v121_v6 = vsel %vm118_vm0, %v119_v3, %v120_v4 }
  0x31   : > { %141 = vrot.lane.b32.xlu1 %v139_v5, %s807_s29 }
  0x32   : > { %124 = vrot.lane.b32.xlu0 %v121_v6, %s807_s29 }
  0x36   : > { %147 = vrot.lane.b32.xlu0 %v145_v7, %s807_s29 }
  0x9f   : > { %v135_v8 = vpop.permute.xlu1 %134 }
  0xa0   : > { %138 = vst.msk [vmem:[#allocation2 + $0x2] sm:$0x1] %vm137_vm1, %v135_v8  ;;  %v123_v9 = vpop.permute.xlu0 %122 }
  0xa1   : > { %129 = vst.msk [vmem:[#allocation2] sm:$0xf8] %vm128_vm2, %v123_v9 }
  0xa3   : > { %v142_v10 = vpop.permute.xlu1 %141 }
  0xa4   : > { %144 = vst.msk [vmem:[#allocation2 + $0x1] sm:$0x1] %vm137_vm1, %v142_v10  ;;  %v125_v11 = vpop.permute.xlu0 %124 }
  0xa5   : > { %131 = vst.msk [vmem:[#allocation2 + $0x10] sm:$0x3f] %vm130_vm3, %v125_v11 }
  0xa8   : > { %v148_v12 = vpop.permute.xlu0 %147 }
  0xa9   : > { %150 = vst.msk [vmem:[#allocation2] sm:$0x1] %vm137_vm1, %v148_v12 }
  0xaa PF: > { %p643_p8 = scmp.ne.s32.totalorder %s851_s10, 1 }
  0xab   : > { %s808_s30 = smov (!%p643_p8), 3  }
  0xac   : > { %154 = sbr.rel (%p643_p8) target bundleno = 302 (0x12e), region = 36 }
  0xb1   : > { %v155_v13 = vld [vmem:[#allocation5 + $0x5] sm:$0xff]  ;;  %v169_v14 = vld [vmem:[#allocation5 + $0xf] sm:$0x1]  ;;  %v176_v16 = vld [vmem:[#allocation5 + $0xe] sm:$0x1]  ;;  %vm165_vm4 = vcmask 154648  }
  0xb2   : > { %159 = vrot.lane.b32.xlu0 %v155_v13, %s808_s30  ;;  %171 = vrot.lane.b32.xlu1 %v169_v14, %s808_s30  ;;  %v156_v15 = vld [vmem:[#allocation5 + $0xd] sm:$0x7]  ;;  %vm174_vm5 = vcmask 147480   ;;  %vm167_vm6 = vcmask 149528  }
  0xb3   : > { %v182_v17 = vld [vmem:[#allocation5 + $0xd] sm:$0x1] }
  0xb6   : > { %161 = vrot.lane.b32.xlu0 %v156_v15, %s808_s30  ;;  %178 = vrot.lane.b32.xlu1 %v176_v16, %s808_s30 }
  0xba   : > { %184 = vrot.lane.b32.xlu0 %v182_v17, %s808_s30 }
 0x124   : > { %v160_v18 = vpop.permute.xlu0 %159  ;;  %v172_v19 = vpop.permute.xlu1 %171 }
 0x125   : > { %166 = vst.msk [vmem:[#allocation2] sm:$0xff] %vm165_vm4, %v160_v18 }
 0x126   : > { %175 = vst.msk [vmem:[#allocation2 + $0x13] sm:$0x1] %vm174_vm5, %v172_v19 }
 0x128   : > { %v162_v20 = vpop.permute.xlu0 %161  ;;  %v179_v21 = vpop.permute.xlu1 %178 }
 0x129   : > { %168 = vst.msk [vmem:[#allocation2 + $0x10] sm:$0x7] %vm167_vm6, %v162_v20 }
 0x12a   : > { %181 = vst.msk [vmem:[#allocation2 + $0x14] sm:$0x1] %vm174_vm5, %v179_v21 }
 0x12c   : > { %v185_v22 = vpop.permute.xlu0 %184 }
 0x12d   : > { %187 = vst.msk [vmem:[#allocation2 + $0x15] sm:$0x1] %vm174_vm5, %v185_v22 }
 0x12e PF: > { %v188_v23 = vld [vmem:[#allocation2] sm:$0xff]  ;;  %s809_s2 = smov 127   ;;  %vm198_vm7 = vcmask 23568   ;;  %vm200_vm8 = vcmask 21520   ;;  %s810_s3 = smov 1   ;;  %vm212_vm9 = vcmask 162968  }
 0x12f   : > { %192 = vrot.lane.b32.xlu0 %v188_v23, %s809_s2  ;;  %vm214_vm10 = vcmask 160920   ;;  %s811_s4 = smov 125   ;;  %vm226_vm11 = vcmask 15368   ;;  %vm228_vm12 = vcmask 13320   ;;  %s812_s5 = smov 3   ;;  %vm240_vm13 = vcmask 171168  }
 0x130   : > { %vm242_vm14 = vcmask 169120   ;;  %vm274_vm15 = vcmask 48128   ;;  %s813_s11 = smov 123   ;;  %v814_v40 = vmov 0.0   ;;  %vm278_vm0 = vcmask 46080   ;;  %s815_s13 = smov 5  }
 0x131   : > { %275 = vst.msk [vmem:[#allocation2 + $0x8] sm:$0xff] %vm274_vm15, %v814_v40  ;;  %vm254_vm1 = vcmask 7168   ;;  %vm256_vm2 = vcmask 5120   ;;  %s816_s14 = smov 124   ;;  %s817_s18 = smov 126   ;;  %vm268_vm3 = vcmask 179368  }
 0x132   : > { %279 = vst.msk [vmem:[#allocation2 + $0x18] sm:$0x3f] %vm278_vm0, %v814_v40  ;;  %s818_s19 = smov 122   ;;  %vm272_vm4 = vcmask 1047728   ;;  %vm270_vm5 = vcmask 177320   ;;  %vm276_vm6 = vcmask 1045680  }
 0x133   : > { %s645_s20 = sshll.u32 %s851_s10, 7  ;;  %s577_s21 = sshll.u32 %s109_s28, 4  ;;  %s578_s21 = int_to_ptr.vmem [resolvable:$true] %s577_s21 }
 0x134   : > { %v189_v24 = vld [vmem:[#allocation2 + $0x10] sm:$0x3f]  ;;  %s575_s24 = scalar_lea.hbm %s1016_s1, %s645_s20  ;;  %s564_s25 = scalar_lea.sflag [#allocation7], %s107_s26 }
 0x135   : > { %194 = vrot.lane.b32.xlu0 %v189_v24, %s809_s2  ;;  %s738_s29 = scalar_lea.vmem %s578_s21, 128  ;;  %s819_s10 = smov [#allocation8]  }
 0x136   : > { %p739_p9 = scmp.ne.s32.totalorder %s578_s21, %s738_s29  ;;  %s742_s30 = sshll.u32 %s819_s10, 4  ;;  %s743_s30 = int_to_ptr.vmem [resolvable:$false] %s742_s30 }
 0x137   : > { %p745_p12 = scmp.lt.s32.totalorder %s578_s21, %s743_s30 }
 0x138   : > { %v369_v46 = vld [vmem:[#allocation2 + $0x8] sm:$0xff]  ;;  %p740_p10 = pnand %p739_p9, %p868_p5 }
 0x139   : > { %v371_v47 = vld [vmem:[#allocation2 + $0x18] sm:$0x3f]  ;;  %v285_v49 = vmul.f32 0.39905027, %v369_v46  ;;  %v308_v52 = vmul.f32 0.21610594, %v369_v46 }
 0x13a   : > { %v451_v48 = vld [vmem:[#allocation2 + $0x18] sm:$0x3f]  ;;  %p741_p11 = pneg %p740_p10 }
 0x13b   : > { %v283_v50 = vld [vmem:[#allocation2 + $0x18] sm:$0x3f] }
 0x13c   : > { %v287_v51 = vmul.f32 0.39905027, %v283_v50  ;;  %v310_v53 = vmul.f32 0.21610594, %v283_v50  ;;  %v332_v54 = vld [vmem:[#allocation2 + $0x18] sm:$0x3f] }
 0x1a1   : > { %v193_v25 = vpop.permute.xlu0 %192 }
 0x1a2   : > { %199 = vst.msk [vmem:[#allocation2] sm:$0xff] %vm198_vm7, %v193_v25  ;;  %vm384_vm7 = vcmask 1014784  }
 0x1a7   : > { %v195_v26 = vpop.permute.xlu0 %194 }
 0x1a8   : > { %201 = vst.msk [vmem:[#allocation2 + $0x10] sm:$0x3f] %vm200_vm8, %v195_v26  ;;  %vm464_vm8 = vcmask 1031168  }
 0x1a9   : > { %v202_v27 = vld [vmem:[#allocation2] sm:$0xff] }
 0x1aa   : > { %206 = vrot.lane.b32.xlu1 %v202_v27, %s810_s3 }
 0x1af   : > { %v203_v28 = vld [vmem:[#allocation2 + $0x10] sm:$0x3f] }
 0x1b0   : > { %208 = vrot.lane.b32.xlu1 %v203_v28, %s810_s3 }
 0x21c   : > { %v207_v29 = vpop.permute.xlu1 %206 }
 0x21d   : > { %213 = vst.msk [vmem:[#allocation2] sm:$0xff] %vm212_vm9, %v207_v29  ;;  %vm345_vm9 = vcmask 998400  }
 0x222   : > { %v209_v30 = vpop.permute.xlu1 %208 }
 0x223   : > { %215 = vst.msk [vmem:[#allocation2 + $0x10] sm:$0x3f] %vm214_vm10, %v209_v30  ;;  %vm300_vm10 = vcmask 1022976  }
 0x224   : > { %v216_v31 = vld [vmem:[#allocation2] sm:$0xff] }
 0x225   : > { %220 = vrot.lane.b32.xlu0 %v216_v31, %s811_s4 }
 0x22a   : > { %v217_v32 = vld [vmem:[#allocation2 + $0x10] sm:$0x3f] }
 0x22b   : > { %222 = vrot.lane.b32.xlu1 %v217_v32, %s811_s4 }
 0x297   : > { %v221_v33 = vpop.permute.xlu0 %220 }
 0x298   : > { %227 = vst.msk [vmem:[#allocation2] sm:$0xff] %vm226_vm11, %v221_v33  ;;  %vm413_vm11 = vcmask 1039360  }
 0x29d   : > { %v223_v34 = vpop.permute.xlu1 %222 }
 0x29e   : > { %229 = vst.msk [vmem:[#allocation2 + $0x10] sm:$0x3f] %vm228_vm12, %v223_v34 }
 0x29f   : > { %v230_v35 = vld [vmem:[#allocation2] sm:$0xff] }
 0x2a0   : > { %234 = vrot.lane.b32.xlu0 %v230_v35, %s812_s5 }
 0x2a5   : > { %v231_v36 = vld [vmem:[#allocation2 + $0x10] sm:$0x3f] }
 0x2a6   : > { %236 = vrot.lane.b32.xlu1 %v231_v36, %s812_s5 }
 0x312   : > { %v235_v37 = vpop.permute.xlu0 %234 }
 0x313   : > { %241 = vst.msk [vmem:[#allocation2] sm:$0xff] %vm240_vm13, %v235_v37 }
 0x318   : > { %v237_v38 = vpop.permute.xlu1 %236 }
 0x319   : > { %243 = vst.msk [vmem:[#allocation2 + $0x10] sm:$0x3f] %vm242_vm14, %v237_v38 }
 0x31a   : > { %v244_v39 = vld [vmem:[#allocation2] sm:$0xff] }
 0x31b   : > { %248 = vrot.lane.b32.xlu0 %v244_v39, %s813_s11 }
 0x320   : > { %v245_v41 = vld [vmem:[#allocation2 + $0x10] sm:$0x3f] }
 0x321   : > { %250 = vrot.lane.b32.xlu1 %v245_v41, %s813_s11 }
 0x38d   : > { %v249_v42 = vpop.permute.xlu0 %248 }
 0x38e   : > { %255 = vst.msk [vmem:[#allocation2] sm:$0xff] %vm254_vm1, %v249_v42 }
 0x393   : > { %v251_v43 = vpop.permute.xlu1 %250 }
 0x394   : > { %257 = vst.msk [vmem:[#allocation2 + $0x10] sm:$0x3f] %vm256_vm2, %v251_v43 }
 0x395   : > { %v258_v44 = vld [vmem:[#allocation2] sm:$0xff] }
 0x396   : > { %262 = vrot.lane.b32.xlu0 %v258_v44, %s815_s13 }
 0x39b   : > { %v259_v45 = vld [vmem:[#allocation2 + $0x10] sm:$0x3f] }
 0x39c   : > { %264 = vrot.lane.b32.xlu1 %v259_v45, %s815_s13 }
 0x3a0   : > { %378 = vrot.lane.b32.xlu1 %v369_v46, %s816_s14 }
 0x3a4   : > { %382 = vrot.lane.b32.xlu1 %v371_v47, %s816_s14 }
 0x3a8   : > { %458 = vrot.lane.b32.xlu1 %v369_v46, %s817_s18 }
 0x3ac   : > { %462 = vrot.lane.b32.xlu1 %v451_v48, %s817_s18 }
 0x3b0   : > { %294 = vrot.lane.b32.xlu1 %v285_v49, %s811_s4 }
 0x3b4   : > { %298 = vrot.lane.b32.xlu1 %v287_v51, %s811_s4 }
 0x3b8   : > { %317 = vrot.lane.b32.xlu1 %v308_v52, %s811_s4 }
 0x3bc   : > { %321 = vrot.lane.b32.xlu1 %v310_v53, %s811_s4 }
 0x3c0   : > { %339 = vrot.lane.b32.xlu1 %v369_v46, %s818_s19 }
 0x3c4   : > { %343 = vrot.lane.b32.xlu1 %v332_v54, %s818_s19 }
 0x408   : > { %v263_v55 = vpop.permute.xlu0 %262 }
 0x409   : > { %269 = vst.msk [vmem:[#allocation2] sm:$0xff] %vm268_vm3, %v263_v55 }
 0x40a   : > { %273 = vst.msk [vmem:[#allocation2] sm:$0xff] %vm272_vm4, %v814_v40 }
 0x40e   : > { %v265_v56 = vpop.permute.xlu1 %264 }
 0x40f   : > { %271 = vst.msk [vmem:[#allocation2 + $0x10] sm:$0x3f] %vm270_vm5, %v265_v56 }
 0x410   : > { %277 = vst.msk [vmem:[#allocation2 + $0x10] sm:$0x3f] %vm276_vm6, %v814_v40 }
 0x411   : > { %v920_v58 = vld [vmem:[#allocation2] sm:$0xff] }
 0x412   : > { %v379_v57 = vpop.permute.xlu1 %378  ;;  %376 = vrot.lane.b32.xlu0 %v920_v58, %s816_s14  ;;  %v284_v11 = vmul.f32 0.39905027, %v920_v58  ;;  %v307_v16 = vmul.f32 0.21610594, %v920_v58 }
 0x413   : > { %v392_v59 = vadd.f32 %v379_v57, %v369_v46 }
 0x415   : > { %v398_v60 = vmul.f32 0.054005582, %v392_v59  ;;  %v425_v2 = vmul.f32 0.13107488, %v392_v59 }
 0x416   : > { %v383_v61 = vpop.permute.xlu1 %382 }
 0x417   : > { %v370_v62 = vld [vmem:[#allocation2 + $0x10] sm:$0x3f]  ;;  %v394_v63 = vadd.f32 %v383_v61, %v371_v47  ;;  %407 = vrot.lane.b32.xlu1 %v398_v60, %s809_s2 }
 0x418   : > { %380 = vrot.lane.b32.xlu0 %v370_v62, %s816_s14  ;;  %v450_v3 = vld [vmem:[#allocation2 + $0x10] sm:$0x3f] }
 0x419   : > { %v400_v0 = vmul.f32 0.054005582, %v394_v63  ;;  %v427_v4 = vmul.f32 0.13107488, %v394_v63  ;;  %v934_v9 = vld [vmem:[#allocation2 + $0x10] sm:$0x3f] }
 0x41a   : > { %v459_v1 = vpop.permute.xlu1 %458  ;;  %v282_v12 = vld [vmem:[#allocation2 + $0x10] sm:$0x3f] }
 0x41b   : > { %411 = vrot.lane.b32.xlu1 %v400_v0, %s809_s2  ;;  %v472_v5 = vadd.f32 %v459_v1, %v369_v46  ;;  %v286_v14 = vmul.f32 0.39905027, %v282_v12  ;;  %v309_v17 = vmul.f32 0.21610594, %v282_v12 }
 0x41c   : > { %456 = vrot.lane.b32.xlu0 %v920_v58, %s817_s18 }
 0x41d   : > { %v478_v7 = vmul.f32 0.24203622, %v472_v5  ;;  %v504_v13 = vmul.f32 0.19071282, %v472_v5 }
 0x41e   : > { %v463_v6 = vpop.permute.xlu1 %462 }
 0x41f   : > { %434 = vrot.lane.b32.xlu1 %v425_v2, %s809_s2  ;;  %v474_v8 = vadd.f32 %v463_v6, %v451_v48 }
 0x420   : > { %460 = vrot.lane.b32.xlu0 %v450_v3, %s817_s18 }
 0x421   : > { %v480_v10 = vmul.f32 0.24203622, %v474_v8  ;;  %v506_v15 = vmul.f32 0.19071282, %v474_v8 }
 0x422   : > { %v295_v18 = vpop.permute.xlu1 %294 }
 0x423   : > { %438 = vrot.lane.b32.xlu1 %v427_v4, %s809_s2 }
 0x424   : > { %337 = vrot.lane.b32.xlu0 %v920_v58, %s818_s19 }
 0x426   : > { %v299_v19 = vpop.permute.xlu1 %298 }
 0x427   : > { %487 = vrot.lane.b32.xlu1 %v478_v7, %s817_s18 }
 0x428   : > { %341 = vrot.lane.b32.xlu0 %v934_v9, %s818_s19 }
 0x42a   : > { %v318_v23 = vpop.permute.xlu1 %317 }
 0x42b   : > { %491 = vrot.lane.b32.xlu1 %v480_v10, %s817_s18 }
 0x42c   : > { %292 = vrot.lane.b32.xlu0 %v284_v11, %s811_s4 }
 0x42e   : > { %v322_v30 = vpop.permute.xlu1 %321 }
 0x42f   : > { %513 = vrot.lane.b32.xlu1 %v504_v13, %s817_s18 }
 0x430   : > { %296 = vrot.lane.b32.xlu0 %v286_v14, %s811_s4 }
 0x432   : > { %v340_v35 = vpop.permute.xlu1 %339 }
 0x433   : > { %517 = vrot.lane.b32.xlu1 %v506_v15, %s817_s18 }
 0x434   : > { %315 = vrot.lane.b32.xlu0 %v307_v16, %s811_s4 }
 0x436   : > { %v344_v47 = vpop.permute.xlu1 %343 }
 0x438   : > { %319 = vrot.lane.b32.xlu0 %v309_v17, %s811_s4 }
 0x484   : > { %v377_v20 = vpop.permute.xlu0 %376 }
 0x485   : > { %v385_v21 = vsel %vm384_vm7, %v377_v20, %v379_v57 }
 0x486   : > { %v391_v22 = vadd.f32 %v385_v21, %v920_v58 }
 0x488   : > { %v397_v25 = vmul.f32 0.054005582, %v391_v22  ;;  %v424_v32 = vmul.f32 0.13107488, %v391_v22 }
 0x489   : > { %v408_v4 = vpop.permute.xlu1 %407 }
 0x48a   : > { %v381_v24 = vpop.permute.xlu0 %380  ;;  %405 = vrot.lane.b32.xlu0 %v397_v25, %s809_s2 }
 0x48b   : > { %v386_v26 = vsel %vm384_vm7, %v381_v24, %v383_v61 }
 0x48c   : > { %v393_v27 = vadd.f32 %v386_v26, %v370_v62 }
 0x48d   : > { %v412_v5 = vpop.permute.xlu1 %411 }
 0x48e   : > { %v399_v28 = vmul.f32 0.054005582, %v393_v27  ;;  %v457_v29 = vpop.permute.xlu0 %456  ;;  %v426_v37 = vmul.f32 0.13107488, %v393_v27 }
 0x48f   : > { %v465_v31 = vsel %vm464_vm8, %v457_v29, %v459_v1 }
 0x490   : > { %409 = vrot.lane.b32.xlu0 %v399_v28, %s809_s2  ;;  %v471_v34 = vadd.f32 %v465_v31, %v920_v58 }
 0x492   : > { %v461_v33 = vpop.permute.xlu0 %460  ;;  %v477_v41 = vmul.f32 0.24203622, %v471_v34  ;;  %v503_v51 = vmul.f32 0.19071282, %v471_v34 }
 0x493   : > { %v466_v36 = vsel %vm464_vm8, %v461_v33, %v463_v6  ;;  %v435_v6 = vpop.permute.xlu1 %434 }
 0x494   : > { %432 = vrot.lane.b32.xlu0 %v424_v32, %s809_s2  ;;  %v473_v40 = vadd.f32 %v466_v36, %v450_v3 }
 0x496   : > { %v338_v38 = vpop.permute.xlu0 %337  ;;  %v479_v44 = vmul.f32 0.24203622, %v473_v40  ;;  %v505_v56 = vmul.f32 0.19071282, %v473_v40 }
 0x497   : > { %v346_v39 = vsel %vm345_vm9, %v338_v38, %v340_v35  ;;  %v439_v8 = vpop.permute.xlu1 %438 }
 0x498   : > { %436 = vrot.lane.b32.xlu0 %v426_v37, %s809_s2  ;;  %v350_v42 = vadd.f32 %v920_v58, %v346_v39  ;;  %s744_s2 = scalar_lea.vmem %s743_s30, 256 }
 0x499   : > { %p746_p13 = scmp.lt.s32.totalorder %s744_s2, %s738_s29 }
 0x49a   : > { %v342_v43 = vpop.permute.xlu0 %341  ;;  %v354_v45 = vmul.f32 0.004433048, %v350_v42  ;;  %v362_v54 = vmul.f32 0.07015932, %v350_v42 }
 0x49b   : > { %v347_v50 = vsel %vm345_vm9, %v342_v43, %v344_v47  ;;  %v488_v14 = vpop.permute.xlu1 %487  ;;  %p747_p0 = por %p746_p13, %p745_p12 }
 0x49c   : > { %485 = vrot.lane.b32.xlu0 %v477_v41, %s817_s18  ;;  %v351_v55 = vadd.f32 %v347_v50, %v934_v9 }
 0x49d   : > { %p748_p1 = pnand %p747_p0, %p741_p11 }
 0x49e   : > { %v293_v46 = vpop.permute.xlu0 %292  ;;  %v355_v60 = vmul.f32 0.004433048, %v351_v55  ;;  %v363_v1 = vmul.f32 0.07015932, %v351_v55 }
 0x49f   : > { %v301_v48 = vsel %vm300_vm10, %v293_v46, %v295_v18  ;;  %v492_v21 = vpop.permute.xlu1 %491 }
 0x4a0   : > { %489 = vrot.lane.b32.xlu0 %v479_v44, %s817_s18  ;;  %v356_v49 = vadd.f32 %v354_v45, %v301_v48 }
 0x4a2   : > { %v297_v52 = vpop.permute.xlu0 %296 }
 0x4a3   : > { %v302_v53 = vsel %vm300_vm10, %v297_v52, %v299_v19  ;;  %v514_v29 = vpop.permute.xlu1 %513 }
 0x4a4   : > { %511 = vrot.lane.b32.xlu0 %v503_v51, %s817_s18  ;;  %306 = vst [vmem:[#allocation3 + $0x8] sm:$0x3f] %v302_v53 }
 0x4a6   : > { %v316_v57 = vpop.permute.xlu0 %315 }
 0x4a7   : > { %v323_v58 = vsel %vm300_vm10, %v316_v57, %v318_v23  ;;  %v518_v35 = vpop.permute.xlu1 %517 }
 0x4a8   : > { %515 = vrot.lane.b32.xlu0 %v505_v56, %s817_s18  ;;  %v364_v59 = vadd.f32 %v362_v54, %v323_v58 }
 0x4aa   : > { %v320_v61 = vpop.permute.xlu0 %319 }
 0x4ab   : > { %v324_v62 = vsel %vm300_vm10, %v320_v61, %v322_v30  ;;  %v353_v63 = vld [vmem:[#allocation3 + $0x8] sm:$0x3f] }
 0x4ac   : > { %328 = vst [vmem:[#allocation4 + $0x8] sm:$0x3f] %v324_v62  ;;  %v357_v0 = vadd.f32 %v355_v60, %v353_v63 }
 0x4ae   : > { %359 = vst [vmem:[#allocation3 + $0x8] sm:$0x3f] %v357_v0 }
 0x4b3   : > { %v361_v2 = vld [vmem:[#allocation4 + $0x8] sm:$0x3f] }
 0x4b4   : > { %v365_v3 = vadd.f32 %v363_v1, %v361_v2 }
 0x4b5   : > { %v396_v10 = vld [vmem:[#allocation3 + $0x8] sm:$0x3f] }
 0x4b6   : > { %367 = vst [vmem:[#allocation4 + $0x8] sm:$0x3f] %v365_v3 }
 0x4bd   : > { %v423_v17 = vld [vmem:[#allocation4 + $0x8] sm:$0x3f] }
 0x4fc   : > { %v406_v7 = vpop.permute.xlu0 %405 }
 0x4fd   : > { %v414_v16 = vsel %vm413_vm11, %v406_v7, %v408_v4 }
 0x4fe   : > { %v418_v20 = vadd.f32 %v414_v16, %v356_v49 }
 0x502   : > { %v410_v9 = vpop.permute.xlu0 %409 }
 0x503   : > { %v415_v11 = vsel %vm413_vm11, %v410_v9, %v412_v5 }
 0x504   : > { %v419_v12 = vadd.f32 %v415_v11, %v396_v10 }
 0x506   : > { %421 = vst [vmem:[#allocation3 + $0x8] sm:$0x3f] %v419_v12  ;;  %v433_v13 = vpop.permute.xlu0 %432 }
 0x507   : > { %v440_v26 = vsel %vm413_vm11, %v433_v13, %v435_v6 }
 0x508   : > { %v444_v31 = vadd.f32 %v440_v26, %v364_v59 }
 0x50a   : > { %v437_v15 = vpop.permute.xlu0 %436 }
 0x50b   : > { %v441_v18 = vsel %vm413_vm11, %v437_v15, %v439_v8 }
 0x50c   : > { %v445_v19 = vadd.f32 %v441_v18, %v423_v17 }
 0x50d   : > { %v476_v27 = vld [vmem:[#allocation3 + $0x8] sm:$0x3f] }
 0x50e   : > { %447 = vst [vmem:[#allocation4 + $0x8] sm:$0x3f] %v445_v19  ;;  %v486_v22 = vpop.permute.xlu0 %485 }
 0x50f   : > { %v493_v23 = vsel %vm464_vm8, %v486_v22, %v488_v14 }
 0x510   : > { %v497_v24 = vadd.f32 %v493_v23, %v418_v20 }
 0x512   : > { %499 = vst [vmem:[#allocation3] sm:$0xff] %v497_v24  ;;  %v490_v25 = vpop.permute.xlu0 %489 }
 0x513   : > { %v494_v28 = vsel %vm464_vm8, %v490_v25, %v492_v21 }
 0x514   : > { %v498_v30 = vadd.f32 %v494_v28, %v476_v27 }
 0x515   : > { %v502_v37 = vld [vmem:[#allocation4 + $0x8] sm:$0x3f] }
 0x516   : > { %500 = vst [vmem:[#allocation3 + $0x8] sm:$0x3f] %v498_v30  ;;  %v512_v32 = vpop.permute.xlu0 %511 }
 0x517   : > { %v519_v33 = vsel %vm464_vm8, %v512_v32, %v514_v29 }
 0x518   : > { %v523_v34 = vadd.f32 %v519_v33, %v444_v31 }
 0x51a   : > { %525 = vst [vmem:[#allocation4] sm:$0xff] %v523_v34  ;;  %v516_v36 = vpop.permute.xlu0 %515 }
 0x51b   : > { %v520_v38 = vsel %vm464_vm8, %v516_v36, %v518_v35 }
 0x51c   : > { %v524_v39 = vadd.f32 %v520_v38, %v502_v37 }
 0x51d   : > { %v533_v40 = vld [vmem:[#allocation3 + $0x6] sm:$0xff] }
 0x51e   : > { %526 = vst [vmem:[#allocation4 + $0x8] sm:$0x3f] %v524_v39  ;;  %v527_v41 = vld [vmem:[#allocation3 + $0x3] sm:$0xff]  ;;  %v534_v42 = vadd.f32 %v533_v40, %v497_v24 }
 0x51f   : > { %v542_v43 = vld [vmem:[#allocation3 + $0x1] sm:$0xff]  ;;  %v528_v47 = vmul.f32 0.39905027, %v527_v41 }
 0x520   : > { %v543_v46 = vld [vmem:[#allocation3 + $0x5] sm:$0xff]  ;;  %v535_v53 = vmul.f32 0.004433048, %v534_v42 }
 0x521   : > { %v544_v54 = vadd.f32 %v543_v46, %v542_v43  ;;  %v552_v55 = vld [vmem:[#allocation3 + $0x2] sm:$0xff] }
 0x522   : > { %v553_v56 = vld [vmem:[#allocation3 + $0x4] sm:$0xff] }
 0x523   : > { %v545_v63 = vmul.f32 0.054005582, %v544_v54  ;;  %v554_v0 = vadd.f32 %v553_v56, %v552_v55 }
 0x525   : > { %v529_v44 = vld [vmem:[#allocation4 + $0x3] sm:$0xff]  ;;  %v555_v5 = vmul.f32 0.24203622, %v554_v0 }
 0x526   : > { %v538_v45 = vld [vmem:[#allocation4 + $0x6] sm:$0xff]  ;;  %v530_v48 = vmul.f32 0.21610594, %v529_v44 }
 0x527   : > { %v539_v49 = vadd.f32 %v538_v45, %v523_v34  ;;  %v547_v50 = vld [vmem:[#allocation4 + $0x1] sm:$0xff] }
 0x528   : > { %v548_v51 = vld [vmem:[#allocation4 + $0x5] sm:$0xff]  ;;  %v531_v52 = vsub.f32 %v528_v47, %v530_v48 }
 0x529   : > { %v540_v58 = vmul.f32 0.07015932, %v539_v49  ;;  %v549_v59 = vadd.f32 %v548_v51, %v547_v50  ;;  %v557_v60 = vld [vmem:[#allocation4 + $0x2] sm:$0xff] }
 0x52a   : > { %v536_v57 = vadd.f32 %v535_v53, %v531_v52  ;;  %v558_v61 = vld [vmem:[#allocation4 + $0x4] sm:$0xff] }
 0x52b   : > { %v550_v2 = vmul.f32 0.13107488, %v549_v59  ;;  %v559_v3 = vadd.f32 %v558_v61, %v557_v60 }
 0x52c   : > { %v541_v62 = vsub.f32 %v536_v57, %v540_v58 }
 0x52d   : > { %v560_v7 = vmul.f32 0.19071282, %v559_v3 }
 0x52e   : > { %v546_v1 = vadd.f32 %v545_v63, %v541_v62 }
 0x530   : > { %v551_v4 = vsub.f32 %v546_v1, %v550_v2 }
 0x532   : > { %v556_v6 = vadd.f32 %v555_v5, %v551_v4 }
 0x534   : > { %v561_v8 = vsub.f32 %v556_v6, %v560_v7 }
 0x536   : > { %562 = vst [vmem:[%s109_s28] sm:$0xff] %v561_v8 }
 0x537   : > { %751 = shalt.err (!%p748_p1)
}
 0x538   : > { %s752_s3 = scalar_lea.hbm %s575_s24, 128  ;;  %s756_s28 = scalar_lea.hbm %s1016_s1, 256 }
 0x539   : > { %p753_p2 = scmp.ne.s32.totalorder %s575_s24, %s752_s3  ;;  %p757_p7 = scmp.lt.s32.totalorder %s575_s24, %s1016_s1 }
 0x53a   : > { %p758_p6 = scmp.lt.s32.totalorder %s756_s28, %s752_s3 }
 0x53b   : > { %p754_p3 = pnand %p753_p2, %p868_p5 }
 0x53c   : > { %p759_p8 = por %p758_p6, %p757_p7 }
 0x53d   : > { %p755_p4 = pneg %p754_p3 }
 0x53f   : > { %p760_p9 = pnand %p759_p8, %p755_p4 }
 0x541   : > { %763 = shalt.err (!%p760_p9)
}
 0x542   : > { %652 = dma.vmem_to_hbm [thread:$0]  (%p868_p5), %s578_s21, 128, %s575_s24, %s564_s25  }
 0x543 PF: > { %p664_p10 = scmp.ge.s32.totalorder %s802_s9, 2  ;;  %s589_s11 = sand.u32 1, %s790_s6  }
 0x544   : > { %p1021_p11 = scmp.ne.s32.totalorder %s1018_s17, 0  ;;  %s590_s13 = scalar_lea.sflag [#allocation7], %s589_s11 }
 0x546   : > { %p659_p12 = pnand %p664_p10, %p1021_p11 }
 0x548   : > { %p660_p13 = pneg %p659_p12 }
 0x54a   : > { %785 = dma.done.wait (%p660_p13), %s590_s13, 128  }
 0x54b   : > { %787 = vsyncadd (%p660_p13), %s590_s13, 4294967168  ;;  %p12_p0 = scmp.ge.s32.totalorder %s855_s12, 4   ;;  %s1022_s6 = smov %s794_s7 }
 0x54c   : > { %s1023_s7 = smov %s798_s8  ;;  %s1024_s8 = smov %s866_s15 }
 0x54d   : > { %s1025_s9 = smov %s855_s12  ;;  %14 = sbr.rel (!%p12_p0) target bundleno = 4 (0x4), region = 69 }
 0x552   :  { %595 = vsyncpa [#allocation6], 1 }
 0x553   :  { %597 = vsyncpa [#allocation6 + $0x1], 1 }
 0x554   :  { %598 = vsyncpa [#allocation7], 1 }
 0x555   :  { %600 = vsyncpa [#allocation7 + $0x1], 1 }

</bundles_post_ra>
